<compile_context>
chip_gen: v7x
topology: tpu7x:2x2x1
jax: 0.10.0
libtpu: 0.0.40
codegen_flags: <defaults>
</compile_context>

<pallas_src>
import functools

import jax
import jax.numpy as jnp
from jax import lax
from jax.experimental import pallas as pl
from jax.experimental.pallas import tpu as pltpu


def _fbn_kernel(x_ref, s_ref, b_ref, o_ref):
    # x_ref/o_ref: (TILE_ROWS, TILE_COLS); s_ref/b_ref: (TILE_ROWS, 1).
    # Per-row scale/shift broadcast across the lane (H*W) axis.
    o_ref[...] = x_ref[...] * s_ref[...] + b_ref[...]


def _largest_divisor(n, unit, cap):
    """Largest multiple-of-`unit` divisor of `n` that is <= cap (>= unit)."""
    best = unit
    d = unit
    while d <= n:
        if n % d == 0 and d <= cap:
            best = d
        d += unit
    return best


def _pick_tiles(rows, cols, itemsize, budget_bytes):
    """Choose (tile_rows, tile_cols) dividing (rows, cols), ~budget per tile."""
    # Lane axis: keep the full H*W extent if an 8-row stripe fits the budget;
    # otherwise split on multiples of 128 (only possible when cols % 128 == 0).
    if cols % 128 == 0 and 8 * cols * itemsize > budget_bytes:
        tile_cols = _largest_divisor(cols, 128,
                                     max(128, budget_bytes // (8 * itemsize)))
    else:
        tile_cols = cols
    # Sublane axis: biggest multiple-of-8 divisor of rows under the budget.
    if rows % 8 != 0:
        # Fall back to a single full-extent block (block dims == array dims is
        # always legal).  TODO(synk): tile ragged row counts for huge tensors.
        tile_rows = rows
    else:
        cap = max(8, budget_bytes // max(1, tile_cols * itemsize))
        tile_rows = _largest_divisor(rows, 8, cap)
    return tile_rows, tile_cols


@functools.partial(jax.jit, static_argnames=("tile_budget_bytes",))
def frozen_batch_norm_2d(x, weight, bias, running_mean, running_var,
                         tile_budget_bytes=4 * 1024 * 1024):
    """x: (N, C, H, W); weight/bias/running_mean/running_var: (C,)."""
    N, C, H, W = x.shape
    rows, cols = N * C, H * W
    itemsize = jnp.dtype(x.dtype).itemsize

    # Precompute per-channel affine once (matches the module: no eps).
    scale = (weight * lax.rsqrt(running_var)).astype(x.dtype)
    shift = (bias - running_mean * scale).astype(x.dtype)

    # Row r of the (N*C, H*W) slab corresponds to channel r % C.
    scale_rows = jnp.tile(scale, N).reshape(rows, 1)
    shift_rows = jnp.tile(shift, N).reshape(rows, 1)

    # Pure view: contiguous NCHW -> (N*C, H*W). No transpose, no pad.
    x2d = x.reshape(rows, cols)

    tile_rows, tile_cols = _pick_tiles(rows, cols, itemsize, tile_budget_bytes)
    grid = (rows // tile_rows, cols // tile_cols)

    data_spec = pl.BlockSpec((tile_rows, tile_cols), lambda i, j: (i, j))
    param_spec = pl.BlockSpec((tile_rows, 1), lambda i, j: (i, 0))

    cost = pl.CostEstimate(
        flops=2 * rows * cols,
        transcendentals=0,
        bytes_accessed=(2 * rows * cols + 2 * rows) * itemsize,
    )

    out2d = pl.pallas_call(
        _fbn_kernel,
        out_shape=jax.ShapeDtypeStruct((rows, cols), x.dtype),
        grid_spec=pltpu.PrefetchScalarGridSpec(
            num_scalar_prefetch=0,
            grid=grid,
            in_specs=[data_spec, param_spec, param_spec],
            out_specs=data_spec,
        ),
        compiler_params=pltpu.CompilerParams(
            dimension_semantics=("parallel", "parallel"),
            vmem_limit_bytes=32 * 1024 * 1024,
        ),
        cost_estimate=cost,
    )(x2d, scale_rows, shift_rows)

    return out2d.reshape(N, C, H, W)


def _reference(x, weight, bias, running_mean, running_var):
    scale = weight * lax.rsqrt(running_var)
    b = bias - running_mean * scale
    return x * scale.reshape(1, -1, 1, 1) + b.reshape(1, -1, 1, 1)


if __name__ == "__main__":
    key = jax.random.PRNGKey(0)
    k_x, k_m, k_v = jax.random.split(key, 3)

    N, C, H, W = 2, 4, 16, 16
    x = jax.random.normal(k_x, (N, C, H, W), dtype=jnp.float32)

    # Frozen buffers, matching FrozenBatchNorm2d.__init__:
    weight = jnp.ones((C,), dtype=jnp.float32)
    bias = jnp.zeros((C,), dtype=jnp.float32)
    running_mean = jax.random.normal(k_m, (C,), dtype=jnp.float32)
    running_var = jnp.abs(jax.random.normal(k_v, (C,), dtype=jnp.float32)) + 0.5

    out = frozen_batch_norm_2d(x, weight, bias, running_mean, running_var)
    out = jax.block_until_ready(out)

    ref = _reference(x, weight, bias, running_mean, running_var)
    assert out.shape == (N, C, H, W)
    assert jnp.allclose(out, ref, atol=1e-5, rtol=1e-5), "mismatch vs reference"

    print("KERNEL_OK")
</pallas_src>

<mosaic_0001>
module attributes {stable_mosaic.version = 11 : i64} {
  func.func @_fbn_kernel(%arg0: i32, %arg1: i32, %arg2: memref<8x256xf32, #tpu.memory_space<vmem>>, %arg3: memref<8x1xf32, #tpu.memory_space<vmem>>, %arg4: memref<8x1xf32, #tpu.memory_space<vmem>>, %arg5: memref<8x256xf32, #tpu.memory_space<vmem>>) attributes {dimension_semantics = [#tpu.dimension_semantics<parallel>, #tpu.dimension_semantics<parallel>], iteration_bounds = array<i64: 1, 1>, scalar_prefetch = 0 : i64, scratch_operands = 0 : i64, tpu.core_type = #tpu.core_type<tc>, window_params = [{transform_indices = @transform_0, window_bounds = array<i64: 8, 256>}, {transform_indices = @transform_1, window_bounds = array<i64: 8, 1>}, {transform_indices = @transform_2, window_bounds = array<i64: 8, 1>}, {transform_indices = @transform_3, window_bounds = array<i64: 8, 256>}]} {
    %c0 = arith.constant 0 : index
    %c0_0 = arith.constant 0 : index
    %0 = vector.load %arg2[%c0, %c0_0] : memref<8x256xf32, #tpu.memory_space<vmem>>, vector<8x256xf32>
    %c0_1 = arith.constant 0 : index
    %c0_2 = arith.constant 0 : index
    %1 = vector.load %arg3[%c0_1, %c0_2] : memref<8x1xf32, #tpu.memory_space<vmem>>, vector<8x1xf32>
    %2 = vector.broadcast %1 : vector<8x1xf32> to vector<8x256xf32>
    %3 = arith.mulf %0, %2 : vector<8x256xf32>
    %c0_3 = arith.constant 0 : index
    %c0_4 = arith.constant 0 : index
    %4 = vector.load %arg4[%c0_3, %c0_4] : memref<8x1xf32, #tpu.memory_space<vmem>>, vector<8x1xf32>
    %5 = vector.broadcast %4 : vector<8x1xf32> to vector<8x256xf32>
    %6 = arith.addf %3, %5 : vector<8x256xf32>
    %c0_5 = arith.constant 0 : index
    %c0_6 = arith.constant 0 : index
    %7 = vector.load %arg5[%c0_5, %c0_6] : memref<8x256xf32, #tpu.memory_space<vmem>>, vector<8x256xf32>
    tpu.vector_store %arg5[%c0_5, %c0_6], %6 {strides = array<i32>} : memref<8x256xf32, #tpu.memory_space<vmem>>, vector<8x256xf32>,
    return
  }
  func.func @transform_0(%arg0: i32, %arg1: i32) -> (i32, i32) {
    %c0_i32 = arith.constant 0 : i32
    return %arg0, %arg1 : i32, i32
  }
  func.func @transform_1(%arg0: i32, %arg1: i32) -> (i32, i32) {
    %c0_i32 = arith.constant 0 : i32
    %c0_i32_0 = arith.constant 0 : i32
    return %arg0, %c0_i32 : i32, i32
  }
  func.func @transform_2(%arg0: i32, %arg1: i32) -> (i32, i32) {
    %c0_i32 = arith.constant 0 : i32
    %c0_i32_0 = arith.constant 0 : i32
    return %arg0, %c0_i32 : i32, i32
  }
  func.func @transform_3(%arg0: i32, %arg1: i32) -> (i32, i32) {
    %c0_i32 = arith.constant 0 : i32
    return %arg0, %arg1 : i32, i32
  }
}

</mosaic_0001>

<bundles_post_ra>
// kernel: tile.18
= control target key start
LH: loop header
LB: loop body
LE: loop exit
PB: predicated region body
PF: predicated region fallthrough
CT: control target
= control target key end

     0   :  { %s22_s0 = inlined_call_operand.vmem [shape: f32[4], index: 0, kind: input, shape index: {}]   ;;  %s23_s1 = inlined_call_operand.vmem [shape: f32[2,4], index: 1, kind: output, shape index: {}]  }
   0x1   :  { %v4_v0 = vld [vmem:[%s22_s0] ss:$0 sm:$0xff] }
   0x2   :  { %5 = vst [vmem:[%s23_s1] sm:$0x3] %v4_v0 }

// kernel: tile.0
= control target key start
LH: loop header
LB: loop body
LE: loop exit
PB: predicated region body
PF: predicated region fallthrough
CT: control target
= control target key end

     0   :  { %s34_s8 = smov 125   ;;  %vm7_vm0 = vcmask 7168   ;;  %s35_s11 = smov 126   ;;  %s61_s0 = inlined_call_operand.vmem [shape: f32[2,4], index: 0, kind: input, shape index: {}]   ;;  %s62_s1 = inlined_call_operand.vmem [shape: f32[8,1], index: 1, kind: output, shape index: {}]  }
   0x1   :  { %v4_v0 = vld [vmem:[%s61_s0] sm:$0x3]  ;;  %s33_s0 = smov 127  }
   0x2   :  { %5 = vst [vmem:[#allocation0] sm:$0x3] %v4_v0 }
   0x9   :  { %v9_v1 = vld [vmem:[#allocation0] sm:$0x3]  }
   0xa   :  { %v21_v2 = vld [vmem:[#allocation0] sm:$0x3]   ;;  %10 = vrot.lane.b32.xlu0 %v9_v1, %s33_s0 }
   0xb   :  { %22 = vrot.lane.b32.xlu1 %v21_v2, %s34_s8  ;;  %v6_v3 = vld [vmem:[#allocation0] sm:$0x3]  }
   0xc   :  { %v15_v4 = vld [vmem:[#allocation0] sm:$0x3]   ;;  %8 = vst.msk [vmem:[%s62_s1] ss:$4 sm:$0x3] %vm7_vm0, %v6_v3  }
   0xe   :  { %16 = vrot.lane.b32.xlu0 %v15_v4, %s35_s11 }
  0x7c   :  { %v11_v5 = vpop.permute.xlu0 %10  }
  0x7d   :  { %v23_v6 = vpop.permute.xlu1 %22   ;;  %27 = vst.msk [vmem:[%s62_s1 + $0x1] ss:$4 sm:$0x3] %vm7_vm0, %v11_v5  }
  0x7e   :  { %29 = vst.msk [vmem:[%s62_s1 + $0x3] ss:$4 sm:$0x3] %vm7_vm0, %v23_v6  }
  0x80   :  { %v17_v7 = vpop.permute.xlu0 %16  }
  0x81   :  { %28 = vst.msk [vmem:[%s62_s1 + $0x2] ss:$4 sm:$0x3] %vm7_vm0, %v17_v7  }

// kernel: frozen_batch_norm_2d.1
= control target key start
LH: loop header
LB: loop body
LE: loop exit
PB: predicated region body
PF: predicated region fallthrough
CT: control target
= control target key end

     0   :  { %v40_v0 = vmov 0   ;;  %s79_s1 = inlined_call_operand.vmem [shape: f32[8,1], index: 1, kind: input, shape index: {}]   ;;  %s80_s2 = inlined_call_operand.vmem [shape: f32[8,1], index: 2, kind: input, shape index: {}]   ;;  %s81_s0 = inlined_call_operand.vmem [shape: f32[8,256], index: 0, kind: input, shape index: {}]   ;;  %s82_s3 = inlined_call_operand.vmem [shape: f32[8,256], index: 3, kind: output, shape index: {}]  }
   0x1   :  { %39 = vset.pattern.permute.xlu0 %v40_v0  ;;  %v16_v1 = vld [vmem:[%s79_s1] sm:$0xff]  ;;  %v15_v5 = vld [vmem:[%s81_s0 + $0x8] sm:$0xff] }
   0x2   :  { %19 = vperm.xlu0 %39, %v16_v1   ;;  %v24_v2 = vld [vmem:[%s80_s2] sm:$0xff] }
   0x3   :  { %v14_v4 = vld [vmem:[%s81_s0] sm:$0xff] }
   0x6   :  { %27 = vperm.xlu0 %39, %v24_v2  }
  0x81   :  { %v20_v3 = vpop.permute.xlu0 %19 }
  0x82   :  { %v22_v6 = vmul.f32 %v20_v3, %v14_v4  ;;  %v23_v7 = vmul.f32 %v20_v3, %v15_v5 }
  0x85   :  { %v28_v8 = vpop.permute.xlu0 %27 }
  0x86   :  { %v30_v9 = vadd.f32 %v28_v8, %v22_v6  ;;  %v31_v10 = vadd.f32 %v28_v8, %v23_v7 }
  0x88   :  { %32 = vst [vmem:[%s82_s3] sm:$0xff] %v30_v9  ;;  %33 = vst [vmem:[%s82_s3 + $0x8] sm:$0xff] %v31_v10 }

</bundles_post_ra>
